<compile_context>
chip_gen: v6e
topology: v6e:2x2x1
jax: 0.10.0
libtpu: 0.0.40
codegen_flags: <defaults>
</compile_context>

<pallas_src>
import numpy as np
import jax
import jax.numpy as jnp
from jax import lax
from jax.experimental import pallas as pl
from jax.experimental.pallas import tpu as pltpu

AGENT_TYPE_NUMBER = 7
ALL_OBJECTS_TYPE_LENGTH_IN_KITCHEN = 70
USED_ACTION_SPACE_LEN = 48
AGENTS_POSE_NUM = 6
OUTPUT_DIM = 128
HIDDEN = OUTPUT_DIM // 4          # 32

# fused one-hot layout (lanes 0..127 of the stage-1 input)
_TYPE_BASE = 0
_OBJ_BASE = AGENT_TYPE_NUMBER                                        # 7
_NAME_BASE = AGENT_TYPE_NUMBER + ALL_OBJECTS_TYPE_LENGTH_IN_KITCHEN  # 77
_OH_WIDTH = 128                                                      # 125 used + 3 pad
# stage-1 K layout: [one-hot 0:128 | idx-cols 128:131 (zero rows) | pose 131:137
#                    | succ 137 | pad 138:144]
_POSE_ROW = _OH_WIDTH + 3        # 131
_SUC_ROW = _POSE_ROW + AGENTS_POSE_NUM   # 137
_K1 = _OH_WIDTH + 16             # 144 (whole merged input appended, unused rows zero)


# ----------------------------------------------------------------------------
# Kernel
# ----------------------------------------------------------------------------
def agent_encoder_kernel(
    flt_ref,          # (TB, 16) f32 : [type_idx, obj_idx+7, name_idx+77, pose(6), succ, 0*6]
    w1_ref, b1_ref,   # (144, 160) bf16, (1, 160) f32 : block-diag embeddings + pose/suc first linears
    w2_ref, b2_ref,   # (160, 224) bf16, (1, 224) f32 : block-diag second-stage linears
    w3_ref, b3_ref,   # (224, 32) bf16, (1, 32) f32   : action_encoder Linear(3H,H), rows 0:128 zero
    w4_ref, b4_ref,   # (32, 128) bf16, (1, 128) f32  : action_encoder Linear(H,2H), cols 0:64 zero
    w5_ref, b5_ref,   # (128, 128) bf16, (1, 128) f32 : agent_encoder Linear(4H,128)
    out_ref,          # (TB, 128) f32
):
    flt = flt_ref[...]                                   # (TB, 16) f32
    tb = flt.shape[0]

    # Fused one-hot over the three vocabularies (disjoint, pre-offset index ranges).
    idx = flt[:, 0:3].astype(jnp.int32)                  # exact small integers
    iota = lax.broadcasted_iota(jnp.int32, (tb, _OH_WIDTH), 1)
    oh = (iota == idx[:, 0:1]) | (iota == idx[:, 1:2]) | (iota == idx[:, 2:3])

    # Stage-1 input: concat lands at the 128-lane boundary -> no cross-lane shuffles.
    x = jnp.concatenate([oh.astype(jnp.bfloat16), flt.astype(jnp.bfloat16)], axis=-1)

    # Stage 1: embeddings + pose/succ first linears (block-diagonal), f32 bias add.
    h1 = jnp.dot(x, w1_ref[...], preferred_element_type=jnp.float32) + b1_ref[...]
    h1 = jnp.maximum(h1, 0.0)                            # ReLU of all five branches (TB,160)

    # Stage 2: five Linear(H,H) as one block-diag matmul.
    # Output cols: [type 0:32 | pose 32:64 | zeros 64:128 | obj 128:160 | name 160:192 | suc 192:224]
    h2 = jnp.dot(h1.astype(jnp.bfloat16), w2_ref[...],
                 preferred_element_type=jnp.float32) + b2_ref[...]

    # action_encoder: Linear(3H,H) -> ReLU -> Linear(H,2H) (padded to 128 output lanes).
    c = jnp.dot(h2.astype(jnp.bfloat16), w3_ref[...],
                preferred_element_type=jnp.float32) + b3_ref[...]
    c = jnp.maximum(c, 0.0)
    last_pad = jnp.dot(c.astype(jnp.bfloat16), w4_ref[...],
                       preferred_element_type=jnp.float32) + b4_ref[...]   # lanes 64:128 = last_action

    # agent_encoder input: lanes 0:64 = [type|pose], 64:128 = last_action.
    # h2[:, 64:128] and last_pad[:, 0:64] are exact zeros by construction, so a
    # single add assembles the 4H slab; ReLU distributes over the disjoint lanes.
    agents_in = jnp.maximum(h2[:, :128] + last_pad, 0.0)
    out_ref[...] = jnp.dot(agents_in.astype(jnp.bfloat16), w5_ref[...],
                           preferred_element_type=jnp.float32) + b5_ref[...]


# ----------------------------------------------------------------------------
# Parameters (deterministic synthetic init, per-branch like the PyTorch module)
# ----------------------------------------------------------------------------
def init_params(key):
    ks = jax.random.split(key, 32)
    i = iter(range(32))

    def w(shape, scale=0.1):
        return (scale * jax.random.normal(ks[next(i)], shape)).astype(jnp.float32)

    H = HIDDEN
    return dict(
        type_emb=w((AGENT_TYPE_NUMBER, H)),
        type_w=w((H, H)), type_b=w((1, H)),
        obj_emb=w((ALL_OBJECTS_TYPE_LENGTH_IN_KITCHEN, H)),
        obj_w=w((H, H)), obj_b=w((1, H)),
        act_emb=w((USED_ACTION_SPACE_LEN, H)),
        act_w=w((H, H)), act_b=w((1, H)),
        pose_w1=w((AGENTS_POSE_NUM, H)), pose_b1=w((1, H)),
        pose_w2=w((H, H)), pose_b2=w((1, H)),
        suc_w1=w((1, H)), suc_b1=w((1, H)),
        suc_w2=w((H, H)), suc_b2=w((1, H)),
        aw1=w((3 * H, H)), ab1=w((1, H)),
        aw2=w((H, 2 * H)), ab2=w((1, 2 * H)),
        agent_w=w((4 * H, OUTPUT_DIM)), agent_b=w((1, OUTPUT_DIM)),
    )


# ----------------------------------------------------------------------------
# Pack per-branch params into fused block-diagonal operands (weights -> bf16)
# ----------------------------------------------------------------------------
def pack_params(p):
    H = HIDDEN
    f32 = jnp.float32

    # Stage 1: (144, 160). Cols: [type | obj | name | pose | suc] (each H wide).
    w1 = jnp.zeros((_K1, 5 * H), f32)
    w1 = w1.at[_TYPE_BASE:_TYPE_BASE + AGENT_TYPE_NUMBER, 0:H].set(p["type_emb"])
    w1 = w1.at[_OBJ_BASE:_OBJ_BASE + ALL_OBJECTS_TYPE_LENGTH_IN_KITCHEN, H:2 * H].set(p["obj_emb"])
    w1 = w1.at[_NAME_BASE:_NAME_BASE + USED_ACTION_SPACE_LEN, 2 * H:3 * H].set(p["act_emb"])
    w1 = w1.at[_POSE_ROW:_POSE_ROW + AGENTS_POSE_NUM, 3 * H:4 * H].set(p["pose_w1"])
    w1 = w1.at[_SUC_ROW:_SUC_ROW + 1, 4 * H:5 * H].set(p["suc_w1"])
    b1 = jnp.concatenate([jnp.zeros((1, 3 * H), f32), p["pose_b1"], p["suc_b1"]], axis=-1)

    # Stage 2: (160, 224). Rows follow h1 layout [type|obj|name|pose|suc];
    # cols [type 0:32 | pose 32:64 | zeros 64:128 | obj 128:160 | name 160:192 | suc 192:224].
    w2 = jnp.zeros((5 * H, 7 * H), f32)
    w2 = w2.at[0:H,         0:H        ].set(p["type_w"])
    w2 = w2.at[H:2 * H,     4 * H:5 * H].set(p["obj_w"])
    w2 = w2.at[2 * H:3 * H, 5 * H:6 * H].set(p["act_w"])
    w2 = w2.at[3 * H:4 * H, H:2 * H    ].set(p["pose_w2"])
    w2 = w2.at[4 * H:5 * H, 6 * H:7 * H].set(p["suc_w2"])
    b2 = jnp.concatenate([p["type_b"], p["pose_b2"], jnp.zeros((1, 2 * H), f32),
                          p["obj_b"], p["act_b"], p["suc_b2"]], axis=-1)

    # action_encoder Linear(3H,H): rows 0:128 zero -> consumes h2 cols 128:224 = [obj|name|suc].
    w3 = jnp.zeros((7 * H, H), f32).at[4 * H:7 * H, :].set(p["aw1"])
    b3 = p["ab1"]
    # action_encoder Linear(H,2H), padded to 128 output lanes (cols 0:64 exact zero).
    w4 = jnp.zeros((H, 4 * H), f32).at[:, 2 * H:4 * H].set(p["aw2"])
    b4 = jnp.concatenate([jnp.zeros((1, 2 * H), f32), p["ab2"]], axis=-1)

    # Final agent_encoder Linear(4H,128): row order [type|pose|last] already matches.
    w5 = p["agent_w"]
    b5 = p["agent_b"]

    packed = []
    for w, b in zip([w1, w2, w3, w4, w5], [b1, b2, b3, b4, b5]):
        packed += [w.astype(jnp.bfloat16), b.astype(jnp.float32)]
    return packed


def _round_up(x, m):
    return ((x + m - 1) // m) * m


# ----------------------------------------------------------------------------
# Wrapper
# ----------------------------------------------------------------------------
def agent_encoder_forward(params, agents_type, agents_pose, agents_action,
                          *, block_b=1024):
    batch_shape = agents_pose.shape[:-1]
    B = int(np.prod(batch_shape))

    # --- pack all inputs into one lane-dense (B, 16) f32 stream ---
    act = agents_action.reshape(B, 3)
    type_idx = agents_type.reshape(B).astype(jnp.int32) + _TYPE_BASE
    obj_idx = act[:, 1].astype(jnp.int32) + _OBJ_BASE
    name_idx = act[:, 0].astype(jnp.int32) + _NAME_BASE
    pose = agents_pose.reshape(B, AGENTS_POSE_NUM).astype(jnp.float32)
    succ = act[:, 2:3].astype(jnp.float32)
    flt = jnp.concatenate(
        [type_idx[:, None].astype(jnp.float32),
         obj_idx[:, None].astype(jnp.float32),
         name_idx[:, None].astype(jnp.float32),
         pose, succ, jnp.zeros((B, 6), jnp.float32)], axis=-1)          # (B, 16)

    # --- tile the batch axis (guarantee >=2 grid steps when possible: v7x 2-TC) ---
    TB = min(int(block_b), _round_up(B, 8))
    if B > 8:
        TB = min(TB, _round_up((B + 1) // 2, 8))
    num_blocks = pl.cdiv(B, TB)
    B_pad = num_blocks * TB
    if B_pad > B:
        flt = jnp.pad(flt, ((0, B_pad - B), (0, 0)))   # padded rows are garbage, sliced off below

    packed = pack_params(params)

    # --- cost estimate (helps XLA schedule surrounding glue) ---
    kn = (_K1 * 160 + 160 * 224 + 224 * 32 + 32 * 128 + 128 * 128)
    weight_bytes = int(sum(int(np.prod(a.shape)) * a.dtype.itemsize for a in packed))
    cost = pl.CostEstimate(
        flops=2 * B_pad * kn,
        transcendentals=0,
        bytes_accessed=B_pad * (16 * 4 + OUTPUT_DIM * 4) + weight_bytes,
    )

    act_spec = pl.BlockSpec((TB, 16), lambda i: (i, 0))
    res_spec = lambda a: pl.BlockSpec(a.shape, lambda i: (0, 0))   # VMEM-resident weights/biases

    out = pl.pallas_call(
        agent_encoder_kernel,
        out_shape=jax.ShapeDtypeStruct((B_pad, OUTPUT_DIM), jnp.float32),
        grid=(num_blocks,),
        in_specs=[act_spec] + [res_spec(a) for a in packed],
        out_specs=pl.BlockSpec((TB, OUTPUT_DIM), lambda i: (i, 0)),
        compiler_params=pltpu.CompilerParams(
            dimension_semantics=("parallel",),       # 2-TC sharding on v7x, no-op elsewhere
            vmem_limit_bytes=32 * 1024 * 1024,
        ),
        cost_estimate=cost,
    )(flt, *packed)

    return out[:B].reshape(*batch_shape, OUTPUT_DIM)


# ----------------------------------------------------------------------------
# Pure-JAX f32 reference (for correctness check)
# ----------------------------------------------------------------------------
def reference_forward(params, agents_type, agents_pose, agents_action):
    batch_shape = agents_pose.shape[:-1]
    B = int(np.prod(batch_shape))
    type_idx = agents_type.reshape(B).astype(jnp.int32)
    pose = agents_pose.reshape(B, AGENTS_POSE_NUM).astype(jnp.float32)
    act = agents_action.reshape(B, 3)
    name_idx = act[:, 0].astype(jnp.int32)
    obj_idx = act[:, 1].astype(jnp.int32)
    succ = act[:, 2:3].astype(jnp.float32)

    def emb_mlp(idx, table, w, b):
        e = table[idx]
        return jnp.maximum(e, 0.0) @ w + b

    def lin_mlp(x, w1, b1, w2, b2):
        return jnp.maximum(x @ w1 + b1, 0.0) @ w2 + b2

    p = params
    type_e = emb_mlp(type_idx, p["type_emb"], p["type_w"], p["type_b"])
    obj_e = emb_mlp(obj_idx, p["obj_emb"], p["obj_w"], p["obj_b"])
    name_e = emb_mlp(name_idx, p["act_emb"], p["act_w"], p["act_b"])
    pose_e = lin_mlp(pose, p["pose_w1"], p["pose_b1"], p["pose_w2"], p["pose_b2"])
    suc_e = lin_mlp(succ, p["suc_w1"], p["suc_b1"], p["suc_w2"], p["suc_b2"])
    last = lin_mlp(jnp.concatenate([obj_e, name_e, suc_e], -1),
                   p["aw1"], p["ab1"], p["aw2"], p["ab2"])
    agents_in = jnp.maximum(jnp.concatenate([type_e, pose_e, last], -1), 0.0)
    out = agents_in @ p["agent_w"] + p["agent_b"]
    return out.reshape(*batch_shape, OUTPUT_DIM)


# ----------------------------------------------------------------------------
if __name__ == "__main__":
    key = jax.random.PRNGKey(0)
    k_param, k_type, k_pose, k_name, k_obj, k_suc = jax.random.split(key, 6)

    params = init_params(k_param)

    batch, num_agents = 2, 4
    agents_type = jax.random.randint(
        k_type, (batch, num_agents, 1), 0, AGENT_TYPE_NUMBER, dtype=jnp.int32)
    agents_pose = jax.random.normal(k_pose, (batch, num_agents, AGENTS_POSE_NUM),
                                    dtype=jnp.float32)
    action_name = jax.random.randint(
        k_name, (batch, num_agents, 1), 0, USED_ACTION_SPACE_LEN).astype(jnp.float32)
    held_obj = jax.random.randint(
        k_obj, (batch, num_agents, 1), 0,
        ALL_OBJECTS_TYPE_LENGTH_IN_KITCHEN).astype(jnp.float32)
    success = jax.random.bernoulli(k_suc, 0.5, (batch, num_agents, 1)).astype(jnp.float32)
    agents_action = jnp.concatenate([action_name, held_obj, success], axis=-1)

    out = agent_encoder_forward(params, agents_type, agents_pose, agents_action)
    out = jax.block_until_ready(out)

    ref = reference_forward(params, agents_type, agents_pose, agents_action)
    assert out.shape == (batch, num_agents, OUTPUT_DIM), out.shape
    # bf16 MXU operands with f32 accumulation: compare against the f32 reference
    # at a bf16-appropriate tolerance.
    assert np.allclose(np.asarray(out), np.asarray(ref), rtol=2e-2, atol=2e-2), \
        "Pallas kernel output mismatch vs pure-JAX reference"

    print("KERNEL_OK")
</pallas_src>

<mosaic_0001>
module attributes {stable_mosaic.version = 11 : i64} {
  func.func @agent_encoder_kernel(%arg0: i32, %arg1: memref<8x16xf32, #tpu.memory_space<vmem>>, %arg2: memref<144x160xbf16, #tpu.memory_space<vmem>>, %arg3: memref<1x160xf32, #tpu.memory_space<vmem>>, %arg4: memref<160x224xbf16, #tpu.memory_space<vmem>>, %arg5: memref<1x224xf32, #tpu.memory_space<vmem>>, %arg6: memref<224x32xbf16, #tpu.memory_space<vmem>>, %arg7: memref<1x32xf32, #tpu.memory_space<vmem>>, %arg8: memref<32x128xbf16, #tpu.memory_space<vmem>>, %arg9: memref<1x128xf32, #tpu.memory_space<vmem>>, %arg10: memref<128x128xbf16, #tpu.memory_space<vmem>>, %arg11: memref<1x128xf32, #tpu.memory_space<vmem>>, %arg12: memref<8x128xf32, #tpu.memory_space<vmem>>) attributes {dimension_semantics = [#tpu.dimension_semantics<parallel>], iteration_bounds = array<i64: 1>, scalar_prefetch = 0 : i64, scratch_operands = 0 : i64, tpu.core_type = #tpu.core_type<tc>, window_params = [{transform_indices = @transform_0, window_bounds = array<i64: 8, 16>}, {pipeline_mode = #tpu.pipeline_mode<synchronous>, transform_indices = @transform_1, window_bounds = array<i64: 144, 160>}, {pipeline_mode = #tpu.pipeline_mode<synchronous>, transform_indices = @transform_2, window_bounds = array<i64: 1, 160>}, {pipeline_mode = #tpu.pipeline_mode<synchronous>, transform_indices = @transform_3, window_bounds = array<i64: 160, 224>}, {pipeline_mode = #tpu.pipeline_mode<synchronous>, transform_indices = @transform_4, window_bounds = array<i64: 1, 224>}, {pipeline_mode = #tpu.pipeline_mode<synchronous>, transform_indices = @transform_5, window_bounds = array<i64: 224, 32>}, {pipeline_mode = #tpu.pipeline_mode<synchronous>, transform_indices = @transform_6, window_bounds = array<i64: 1, 32>}, {pipeline_mode = #tpu.pipeline_mode<synchronous>, transform_indices = @transform_7, window_bounds = array<i64: 32, 128>}, {pipeline_mode = #tpu.pipeline_mode<synchronous>, transform_indices = @transform_8, window_bounds = array<i64: 1, 128>}, {pipeline_mode = #tpu.pipeline_mode<synchronous>, transform_indices = @transform_9, window_bounds = array<i64: 128, 128>}, {pipeline_mode = #tpu.pipeline_mode<synchronous>, transform_indices = @transform_10, window_bounds = array<i64: 1, 128>}, {transform_indices = @transform_11, window_bounds = array<i64: 8, 128>}]} {
    %c0 = arith.constant 0 : index
    %c0_0 = arith.constant 0 : index
    %0 = vector.load %arg1[%c0, %c0_0] : memref<8x16xf32, #tpu.memory_space<vmem>>, vector<8x16xf32>
    %1 = vector.extract_strided_slice %0 {offsets = [0, 0], sizes = [8, 3], strides = [1, 1]} : vector<8x16xf32> to vector<8x3xf32>
    %2 = arith.fptosi %1 : vector<8x3xf32> to vector<8x3xi32>
    %3 = tpu.iota {dimensions = array<i32: 1>} : vector<8x128xi32>
    %4 = vector.extract_strided_slice %2 {offsets = [0, 0], sizes = [8, 1], strides = [1, 1]} : vector<8x3xi32> to vector<8x1xi32>
    %5 = vector.broadcast %4 : vector<8x1xi32> to vector<8x128xi32>
    %6 = arith.cmpi eq, %3, %5 : vector<8x128xi32>
    %7 = vector.extract_strided_slice %2 {offsets = [0, 1], sizes = [8, 1], strides = [1, 1]} : vector<8x3xi32> to vector<8x1xi32>
    %8 = vector.broadcast %7 : vector<8x1xi32> to vector<8x128xi32>
    %9 = arith.cmpi eq, %3, %8 : vector<8x128xi32>
    %10 = arith.ori %6, %9 : vector<8x128xi1>
    %11 = vector.extract_strided_slice %2 {offsets = [0, 2], sizes = [8, 1], strides = [1, 1]} : vector<8x3xi32> to vector<8x1xi32>
    %12 = vector.broadcast %11 : vector<8x1xi32> to vector<8x128xi32>
    %13 = arith.cmpi eq, %3, %12 : vector<8x128xi32>
    %14 = arith.ori %10, %13 : vector<8x128xi1>
    %15 = arith.extui %14 : vector<8x128xi1> to vector<8x128xi32>
    %16 = arith.sitofp %15 : vector<8x128xi32> to vector<8x128xf32>
    %17 = arith.truncf %16 : vector<8x128xf32> to vector<8x128xbf16>
    %18 = arith.truncf %0 : vector<8x16xf32> to vector<8x16xbf16>
    %19 = tpu.concatenate %17, %18 in 1 : vector<8x128xbf16>, vector<8x16xbf16> -> vector<8x144xbf16>
    %c0_1 = arith.constant 0 : index
    %c0_2 = arith.constant 0 : index
    %20 = vector.load %arg2[%c0_1, %c0_2] : memref<144x160xbf16, #tpu.memory_space<vmem>>, vector<144x160xbf16>
    %cst = arith.constant dense<0.000000e+00> : vector<8x160xf32>
    %21 = tpu.matmul %19, %20, %cst {dimension_numbers = #tpu.dot_dimension_numbers<[1], [0], [0], [1], [0, 0, 1, 1], [], []>} : vector<8x144xbf16>, vector<144x160xbf16>, vector<8x160xf32> -> vector<8x160xf32>
    %c0_3 = arith.constant 0 : index
    %c0_4 = arith.constant 0 : index
    %22 = vector.load %arg3[%c0_3, %c0_4] : memref<1x160xf32, #tpu.memory_space<vmem>>, vector<1x160xf32>
    %23 = vector.broadcast %22 : vector<1x160xf32> to vector<8x160xf32>
    %24 = arith.addf %21, %23 : vector<8x160xf32>
    %cst_5 = arith.constant 0.000000e+00 : f32
    %25 = vector.broadcast %cst_5 : f32 to vector<8x160xf32>
    %26 = arith.maximumf %24, %25 : vector<8x160xf32>
    %27 = arith.truncf %26 : vector<8x160xf32> to vector<8x160xbf16>
    %c0_6 = arith.constant 0 : index
    %c0_7 = arith.constant 0 : index
    %28 = vector.load %arg4[%c0_6, %c0_7] : memref<160x224xbf16, #tpu.memory_space<vmem>>, vector<160x224xbf16>
    %cst_8 = arith.constant dense<0.000000e+00> : vector<8x224xf32>
    %29 = tpu.matmul %27, %28, %cst_8 {dimension_numbers = #tpu.dot_dimension_numbers<[1], [0], [0], [1], [0, 0, 1, 1], [], []>} : vector<8x160xbf16>, vector<160x224xbf16>, vector<8x224xf32> -> vector<8x224xf32>
    %c0_9 = arith.constant 0 : index
    %c0_10 = arith.constant 0 : index
    %30 = vector.load %arg5[%c0_9, %c0_10] : memref<1x224xf32, #tpu.memory_space<vmem>>, vector<1x224xf32>
    %31 = vector.broadcast %30 : vector<1x224xf32> to vector<8x224xf32>
    %32 = arith.addf %29, %31 : vector<8x224xf32>
    %33 = arith.truncf %32 : vector<8x224xf32> to vector<8x224xbf16>
    %c0_11 = arith.constant 0 : index
    %c0_12 = arith.constant 0 : index
    %34 = vector.load %arg6[%c0_11, %c0_12] : memref<224x32xbf16, #tpu.memory_space<vmem>>, vector<224x32xbf16>
    %cst_13 = arith.constant dense<0.000000e+00> : vector<8x32xf32>
    %35 = tpu.matmul %33, %34, %cst_13 {dimension_numbers = #tpu.dot_dimension_numbers<[1], [0], [0], [1], [0, 0, 1, 1], [], []>} : vector<8x224xbf16>, vector<224x32xbf16>, vector<8x32xf32> -> vector<8x32xf32>
    %c0_14 = arith.constant 0 : index
    %c0_15 = arith.constant 0 : index
    %36 = vector.load %arg7[%c0_14, %c0_15] : memref<1x32xf32, #tpu.memory_space<vmem>>, vector<1x32xf32>
    %37 = vector.broadcast %36 : vector<1x32xf32> to vector<8x32xf32>
    %38 = arith.addf %35, %37 : vector<8x32xf32>
    %cst_16 = arith.constant 0.000000e+00 : f32
    %39 = vector.broadcast %cst_16 : f32 to vector<8x32xf32>
    %40 = arith.maximumf %38, %39 : vector<8x32xf32>
    %41 = arith.truncf %40 : vector<8x32xf32> to vector<8x32xbf16>
    %c0_17 = arith.constant 0 : index
    %c0_18 = arith.constant 0 : index
    %42 = vector.load %arg8[%c0_17, %c0_18] : memref<32x128xbf16, #tpu.memory_space<vmem>>, vector<32x128xbf16>
    %cst_19 = arith.constant dense<0.000000e+00> : vector<8x128xf32>
    %43 = tpu.matmul %41, %42, %cst_19 {dimension_numbers = #tpu.dot_dimension_numbers<[1], [0], [0], [1], [0, 0, 1, 1], [], []>} : vector<8x32xbf16>, vector<32x128xbf16>, vector<8x128xf32> -> vector<8x128xf32>
    %c0_20 = arith.constant 0 : index
    %c0_21 = arith.constant 0 : index
    %44 = vector.load %arg9[%c0_20, %c0_21] : memref<1x128xf32, #tpu.memory_space<vmem>>, vector<1x128xf32>
    %45 = vector.broadcast %44 : vector<1x128xf32> to vector<8x128xf32>
    %46 = arith.addf %43, %45 : vector<8x128xf32>
    %47 = vector.extract_strided_slice %32 {offsets = [0, 0], sizes = [8, 128], strides = [1, 1]} : vector<8x224xf32> to vector<8x128xf32>
    %48 = arith.addf %47, %46 : vector<8x128xf32>
    %cst_22 = arith.constant 0.000000e+00 : f32
    %49 = vector.broadcast %cst_22 : f32 to vector<8x128xf32>
    %50 = arith.maximumf %48, %49 : vector<8x128xf32>
    %51 = arith.truncf %50 : vector<8x128xf32> to vector<8x128xbf16>
    %c0_23 = arith.constant 0 : index
    %c0_24 = arith.constant 0 : index
    %52 = vector.load %arg10[%c0_23, %c0_24] : memref<128x128xbf16, #tpu.memory_space<vmem>>, vector<128x128xbf16>
    %cst_25 = arith.constant dense<0.000000e+00> : vector<8x128xf32>
    %53 = tpu.matmul %51, %52, %cst_25 {dimension_numbers = #tpu.dot_dimension_numbers<[1], [0], [0], [1], [0, 0, 1, 1], [], []>} : vector<8x128xbf16>, vector<128x128xbf16>, vector<8x128xf32> -> vector<8x128xf32>
    %c0_26 = arith.constant 0 : index
    %c0_27 = arith.constant 0 : index
    %54 = vector.load %arg11[%c0_26, %c0_27] : memref<1x128xf32, #tpu.memory_space<vmem>>, vector<1x128xf32>
    %55 = vector.broadcast %54 : vector<1x128xf32> to vector<8x128xf32>
    %56 = arith.addf %53, %55 : vector<8x128xf32>
    %c0_28 = arith.constant 0 : index
    %c0_29 = arith.constant 0 : index
    %57 = vector.load %arg12[%c0_28, %c0_29] : memref<8x128xf32, #tpu.memory_space<vmem>>, vector<8x128xf32>
    tpu.vector_store %arg12[%c0_28, %c0_29], %56 {strides = array<i32>} : memref<8x128xf32, #tpu.memory_space<vmem>>, vector<8x128xf32>,
    return
  }
  func.func @transform_0(%arg0: i32) -> (i32, i32) {
    %c0_i32 = arith.constant 0 : i32
    %c0_i32_0 = arith.constant 0 : i32
    return %arg0, %c0_i32 : i32, i32
  }
  func.func @transform_1(%arg0: i32) -> (i32, i32) {
    %c0_i32 = arith.constant 0 : i32
    %c0_i32_0 = arith.constant 0 : i32
    %c0_i32_1 = arith.constant 0 : i32
    return %c0_i32, %c0_i32_0 : i32, i32
  }
  func.func @transform_2(%arg0: i32) -> (i32, i32) {
    %c0_i32 = arith.constant 0 : i32
    %c0_i32_0 = arith.constant 0 : i32
    %c0_i32_1 = arith.constant 0 : i32
    return %c0_i32, %c0_i32_0 : i32, i32
  }
  func.func @transform_3(%arg0: i32) -> (i32, i32) {
    %c0_i32 = arith.constant 0 : i32
    %c0_i32_0 = arith.constant 0 : i32
    %c0_i32_1 = arith.constant 0 : i32
    return %c0_i32, %c0_i32_0 : i32, i32
  }
  func.func @transform_4(%arg0: i32) -> (i32, i32) {
    %c0_i32 = arith.constant 0 : i32
    %c0_i32_0 = arith.constant 0 : i32
    %c0_i32_1 = arith.constant 0 : i32
    return %c0_i32, %c0_i32_0 : i32, i32
  }
  func.func @transform_5(%arg0: i32) -> (i32, i32) {
    %c0_i32 = arith.constant 0 : i32
    %c0_i32_0 = arith.constant 0 : i32
    %c0_i32_1 = arith.constant 0 : i32
    return %c0_i32, %c0_i32_0 : i32, i32
  }
  func.func @transform_6(%arg0: i32) -> (i32, i32) {
    %c0_i32 = arith.constant 0 : i32
    %c0_i32_0 = arith.constant 0 : i32
    %c0_i32_1 = arith.constant 0 : i32
    return %c0_i32, %c0_i32_0 : i32, i32
  }
  func.func @transform_7(%arg0: i32) -> (i32, i32) {
    %c0_i32 = arith.constant 0 : i32
    %c0_i32_0 = arith.constant 0 : i32
    %c0_i32_1 = arith.constant 0 : i32
    return %c0_i32, %c0_i32_0 : i32, i32
  }
  func.func @transform_8(%arg0: i32) -> (i32, i32) {
    %c0_i32 = arith.constant 0 : i32
    %c0_i32_0 = arith.constant 0 : i32
    %c0_i32_1 = arith.constant 0 : i32
    return %c0_i32, %c0_i32_0 : i32, i32
  }
  func.func @transform_9(%arg0: i32) -> (i32, i32) {
    %c0_i32 = arith.constant 0 : i32
    %c0_i32_0 = arith.constant 0 : i32
    %c0_i32_1 = arith.constant 0 : i32
    return %c0_i32, %c0_i32_0 : i32, i32
  }
  func.func @transform_10(%arg0: i32) -> (i32, i32) {
    %c0_i32 = arith.constant 0 : i32
    %c0_i32_0 = arith.constant 0 : i32
    %c0_i32_1 = arith.constant 0 : i32
    return %c0_i32, %c0_i32_0 : i32, i32
  }
  func.func @transform_11(%arg0: i32) -> (i32, i32) {
    %c0_i32 = arith.constant 0 : i32
    %c0_i32_0 = arith.constant 0 : i32
    return %arg0, %c0_i32 : i32, i32
  }
}

</mosaic_0001>

<bundles_post_ra>
// kernel: tpu_custom_call.1
= control target key start
LH: loop header
LB: loop body
LE: loop exit
PB: predicated region body
PF: predicated region fallthrough
CT: control target
= control target key end

     0   :  { %16 = vsyncpa [#allocation3], 0  ;;  %s1366_s0 = inlined_call_operand.hbm [shape: f32[8,16], index: 0, kind: input, shape index: {}]   ;;  %s1367_s1 = inlined_call_operand.vmem [shape: bf16[144,160], index: 1, kind: input, shape index: {}]   ;;  %s1368_s2 = inlined_call_operand.vmem [shape: f32[1,160], index: 2, kind: input, shape index: {}]   ;;  %s1369_s3 = inlined_call_operand.hbm [shape: bf16[160,224], index: 3, kind: input, shape index: {}]   ;;  %s1370_s4 = inlined_call_operand.vmem [shape: f32[1,224], index: 4, kind: input, shape index: {}]   ;;  %s1371_s5 = inlined_call_operand.vmem [shape: bf16[224,32], index: 5, kind: input, shape index: {}]   ;;  %s1372_s6 = inlined_call_operand.vmem [shape: f32[1,32], index: 6, kind: input, shape index: {}]   ;;  %s1373_s7 = inlined_call_operand.hbm [shape: bf16[32,128], index: 7, kind: input, shape index: {}]   ;;  %s1374_s8 = inlined_call_operand.vmem [shape: f32[1,128], index: 8, kind: input, shape index: {}]   ;;  %s1375_s9 = inlined_call_operand.hbm [shape: bf16[128,128], index: 9, kind: input, shape index: {}]   ;;  %s1376_s10 = inlined_call_operand.vmem [shape: f32[1,128], index: 10, kind: input, shape index: {}]   ;;  %s1377_s11 = inlined_call_operand.hbm [shape: f32[8,128], index: 11, kind: output, shape index: {}]  }
   0x1   :  { %17 = vsyncpa [#allocation6], 0 }
   0x2   :  { %18 = vsyncpa [#allocation9], 0 }
   0x3   :  { %19 = vsyncpa [#allocation4], 0  ;;  %s1148_s17 = smov [#allocation5]  }
   0x4   :  { %s39_s18 = sshll.u32 %s1148_s17, 4  ;;  %s40_s18 = int_to_ptr.vmem [resolvable:$true] %s39_s18 }
   0x5   :  { %s1048_s19 = scalar_lea.vmem %s40_s18, 2560  ;;  %p1053_p1 = scmp.lt.s32.totalorder %s40_s18, %s40_s18 }
   0x6   :  { %p1049_p0 = scmp.ne.s32.totalorder %s40_s18, %s1048_s19  ;;  %p1054_p2 = scmp.lt.s32.totalorder %s1048_s19, %s1048_s19 }
   0x8   :  { %p1055_p3 = por %p1054_p2, %p1053_p1 }
   0xa   :  { %p1056_p4 = pnand %p1055_p3, %p1049_p0 }
   0xc   :  { %1059 = shalt.err (!%p1056_p4)
}
   0xd   :  { %s1149_s20 = smov 128   ;;  %s1150_s21 = smov 8  }
   0xe   :  { %45 = dma.hbm_to_vmem [thread:$0]  %s1369_s3, 2560, %s40_s18, [#allocation6], %s1149_s20, %s1149_s20, %s1150_s21  }
   0xf   :  { %s1151_s24 = smov [#allocation2]   ;;  %s1152_s26 = smov [#allocation7]  }
  0x10   :  { %s26_s25 = sshll.u32 %s1151_s24, 4  ;;  %s57_s27 = sshll.u32 %s1152_s26, 4  ;;  %s27_s25 = int_to_ptr.vmem [resolvable:$true] %s26_s25  ;;  %s58_s27 = int_to_ptr.vmem [resolvable:$true] %s57_s27 }
  0x11   :  { %s1068_s28 = scalar_lea.vmem %s27_s25, 128  ;;  %p1073_p6 = scmp.lt.s32.totalorder %s27_s25, %s27_s25 }
  0x12   :  { %p1069_p5 = scmp.ne.s32.totalorder %s27_s25, %s1068_s28  ;;  %p1074_p7 = scmp.lt.s32.totalorder %s1068_s28, %s1068_s28 }
  0x14   :  { %p1075_p8 = por %p1074_p7, %p1073_p6 }
  0x16   :  { %p1076_p9 = pnand %p1075_p8, %p1069_p5 }
  0x18   :  { %1079 = shalt.err (!%p1076_p9)
}
  0x19   :  { %29 = dma.hbm_to_vmem [thread:$0]  %s1366_s0, 128, %s27_s25, [#allocation3]  }
  0x1a   :  { %s1088_s12 = scalar_lea.vmem %s58_s27, 256  ;;  %p1093_p11 = scmp.lt.s32.totalorder %s58_s27, %s58_s27 }
  0x1b   :  { %p1089_p10 = scmp.ne.s32.totalorder %s58_s27, %s1088_s12  ;;  %p1094_p12 = scmp.lt.s32.totalorder %s1088_s12, %s1088_s12 }
  0x1d   :  { %p1095_p13 = por %p1094_p12, %p1093_p11 }
  0x1f   :  { %p1096_p0 = pnand %p1095_p13, %p1089_p10 }
  0x21   :  { %1099 = shalt.err (!%p1096_p0)
}
  0x22   :  { %s1153_s3 = smov 64   ;;  %s1154_s13 = smov 4  }
  0x23   :  { %63 = dma.hbm_to_vmem [thread:$0]  %s1373_s7, 256, %s58_s27, [#allocation6], %s1153_s3, %s1153_s3, %s1154_s13  }
  0x24   :  { %s1155_s16 = smov [#allocation8]  }
  0x25   :  { %s71_s17 = sshll.u32 %s1155_s16, 4  ;;  %s72_s17 = int_to_ptr.vmem [resolvable:$true] %s71_s17 }
  0x26   :  { %s1108_s18 = scalar_lea.vmem %s72_s17, 1024  ;;  %p1113_p2 = scmp.lt.s32.totalorder %s72_s17, %s72_s17 }
  0x27   :  { %p1109_p1 = scmp.ne.s32.totalorder %s72_s17, %s1108_s18  ;;  %p1114_p3 = scmp.lt.s32.totalorder %s1108_s18, %s1108_s18 }
  0x29   :  { %p1115_p4 = por %p1114_p3, %p1113_p2 }
  0x2b   :  { %p1116_p5 = pnand %p1115_p4, %p1109_p1 }
  0x2d   :  { %1119 = shalt.err (!%p1116_p5)
}
  0x2e   :  { %77 = dma.hbm_to_vmem [thread:$0]  %s1375_s9, 1024, %s72_s17, [#allocation9], %s1153_s3, %s1153_s3, %s1154_s13  }
  0x2f   :  { %1140 = dma.done.wait [#allocation3], 128  }
  0x30   :  { %1141 = vsyncadd [#allocation3], 4294967168 }
  0x31   :  { %1142 = dma.done.wait [#allocation6], 2816  }
  0x32   :  { %1143 = vsyncadd [#allocation6], 4294964480 }
  0x33   :  { %1144 = dma.done.wait [#allocation9], 1024  }
  0x34   :  { %1145 = vsyncadd [#allocation9], 4294966272  ;;  %v1156_v0 = vmov 0   ;;  %v1157_v1 = vmov 2   ;;  %v93_v2 = vld [vmem:[#allocation2] sm:$0xff]  ;;  %vm235_vm0 = vcmask 130048   ;;  %v95_v41 = vlaneseq }
  0x35   :  { %955 = vset.pattern.permute.xlu0 %v1156_v0  ;;  %957 = vset.pattern.permute.xlu1 %v1157_v1  ;;  %v938_v3 = vtrunc.f32 %v93_v2  ;;  %v959_v4 = vld [vmem:[%s1367_s1 + $0x74] ss:$8 sps:$4 sm:$0xff]   ;;  %v961_v5 = vld [vmem:[%s1367_s1 + $0x70] ss:$8 sps:$4 sm:$0xff]   ;;  %v962_v6 = vld [vmem:[%s1367_s1 + $0x64] ss:$8 sps:$4 sm:$0xff]   ;;  %v114_v10 = vpack.c.bf16 %v93_v2, %v93_v2 }
  0x36   :  { %239 = vmatprep.subr.bf16.mxu0 %v959_v4  ;;  %v964_v8 = vld [vmem:[%s1367_s1 + $0x60] ss:$8 sps:$4 sm:$0xff]   ;;  %v965_v9 = vld [vmem:[%s1367_s1 + $0x54] ss:$8 sps:$4 sm:$0xff]   ;;  %v967_v11 = vld [vmem:[%s1367_s1 + $0x50] ss:$8 sps:$4 sm:$0xff]  }
  0x37   :  { %v939_v7 = vcvt.f32.s32 %v938_v3  ;;  %240 = vmatpush1.bf16.msra.mxu0 %v961_v5  ;;  %v1158_v12 = vmov 1   ;;  %v968_v13 = vld [vmem:[%s1367_s1 + $0x44] ss:$8 sps:$4 sm:$0xff]   ;;  %845 = vmatprep.mubr.msk.bf16.mxu0 %vm235_vm0, %v114_v10  ;;  %v970_v14 = vld [vmem:[%s1367_s1 + $0x40] ss:$8 sps:$4 sm:$0xff]   ;;  %v96_v43 = vand.u32 127, %v95_v41 }
  0x38   :  { %241 = vmatprep.subr.bf16.mxu0 %v962_v6  ;;  %v971_v15 = vld [vmem:[%s1367_s1 + $0x34] ss:$8 sps:$4 sm:$0xff]   ;;  %v988_v17 = vld [vmem:[#allocation5 + $0x70] ss:$8 sps:$4 sm:$0xff]   ;;  %v991_v20 = vld [vmem:[#allocation5 + $0x60] ss:$8 sps:$4 sm:$0xff]  }
  0x39   :  { %98 = vperm.xlu0 %955, %v939_v7   ;;  %107 = vperm.xlu1 %957, %v939_v7   ;;  %v986_v16 = vld [vmem:[#allocation5 + $0x74] ss:$8 sps:$4 sm:$0xff]   ;;  %v989_v18 = vld [vmem:[#allocation5 + $0x64] ss:$8 sps:$4 sm:$0xff]   ;;  %v973_v19 = vld [vmem:[%s1367_s1 + $0x30] ss:$8 sps:$4 sm:$0xff]  }
  0x3a   :  { %420 = vmatprep.subr.bf16.mxu1 %v986_v16  ;;  %v974_v21 = vld [vmem:[%s1367_s1 + $0x24] ss:$8 sps:$4 sm:$0xff]   ;;  %v976_v23 = vld [vmem:[%s1367_s1 + $0x20] ss:$8 sps:$4 sm:$0xff]   ;;  %v977_v25 = vld [vmem:[%s1367_s1 + $0x14] ss:$8 sps:$4 sm:$0xff]  }
  0x3b   :  { %242 = vmatpush1.bf16.msra.mxu0 %v964_v8  ;;  %421 = vmatpush1.bf16.msra.mxu1 %v988_v17  ;;  %v992_v22 = vld [vmem:[#allocation5 + $0x54] ss:$8 sps:$4 sm:$0xff]   ;;  %v994_v24 = vld [vmem:[#allocation5 + $0x50] ss:$8 sps:$4 sm:$0xff]   ;;  %v995_v26 = vld [vmem:[#allocation5 + $0x44] ss:$8 sps:$4 sm:$0xff]  }
  0x3c   :  { %243 = vmatprep.subr.bf16.mxu0 %v965_v9  ;;  %422 = vmatprep.subr.bf16.mxu1 %v989_v18  ;;  %v979_v27 = vld [vmem:[%s1367_s1 + $0x10] ss:$8 sps:$4 sm:$0xff]   ;;  %v980_v29 = vld [vmem:[%s1367_s1 + $0x4] ss:$8 sps:$4 sm:$0xff]   ;;  %v982_v31 = vld [vmem:[%s1367_s1] ss:$8 sps:$4 sm:$0xff]  }
  0x3d   :  { %956 = vset.pattern.permute.xlu0 %v1158_v12  ;;  %v997_v28 = vld [vmem:[#allocation5 + $0x40] ss:$8 sps:$4 sm:$0xff]   ;;  %v998_v30 = vld [vmem:[#allocation5 + $0x34] ss:$8 sps:$4 sm:$0xff]   ;;  %v1000_v32 = vld [vmem:[#allocation5 + $0x30] ss:$8 sps:$4 sm:$0xff]  }
  0x3e   :  { %102 = vperm.xlu0 %956, %v939_v7   ;;  %v983_v33 = vld [vmem:[%s1367_s1 + $0x84] ss:$8 sps:$4 sm:$0xff]   ;;  %v985_v35 = vld [vmem:[%s1367_s1 + $0x80] ss:$8 sps:$4 sm:$0xff]   ;;  %v1159_v46 = vmov 1.0|1.0  }
  0x3f   :  { %244 = vmatpush1.bf16.msra.mxu0 %v967_v11  ;;  %423 = vmatpush1.bf16.msra.mxu1 %v991_v20  ;;  %v1001_v34 = vld [vmem:[#allocation5 + $0x24] ss:$8 sps:$4 sm:$0xff]   ;;  %v1003_v36 = vld [vmem:[#allocation5 + $0x20] ss:$8 sps:$4 sm:$0xff]   ;;  %v1004_v37 = vld [vmem:[#allocation5 + $0x14] ss:$8 sps:$4 sm:$0xff]  }
  0x40   :  { %245 = vmatprep.subr.bf16.mxu0 %v968_v13  ;;  %424 = vmatprep.subr.bf16.mxu1 %v992_v22  ;;  %v1006_v38 = vld [vmem:[#allocation5 + $0x10] ss:$8 sps:$4 sm:$0xff]   ;;  %v1007_v39 = vld [vmem:[#allocation5 + $0x4] ss:$8 sps:$4 sm:$0xff]   ;;  %v1009_v40 = vld [vmem:[#allocation5] ss:$8 sps:$4 sm:$0xff]  }
  0x41   :  { %v1010_v47 = vld [vmem:[#allocation5 + $0x94] ss:$8 sps:$4 sm:$0xff]   ;;  %v1012_v48 = vld [vmem:[#allocation5 + $0x90] ss:$8 sps:$4 sm:$0xff]   ;;  %v1013_v49 = vld [vmem:[#allocation5 + $0x84] ss:$8 sps:$4 sm:$0xff]  }
  0x42   :  { %958 = vset.pattern.permute.xlu0 %v1157_v1  ;;  %v1015_v50 = vld [vmem:[#allocation5 + $0x80] ss:$8 sps:$4 sm:$0xff]   ;;  %v1016_v51 = vld [vmem:[%s1371_s5 + $0x38] sm:$0xff]   ;;  %v1019_v54 = vld [vmem:[%s1371_s5 + $0x20] sm:$0xff]   ;;  %v136_v63 = vshrl.u32 %v95_v41, 7  ;;  %vm416_vm7 = vcmask 261120  }
  0x43   :  { %246 = vmatpush1.bf16.msra.mxu0 %v970_v14  ;;  %425 = vmatpush1.bf16.msra.mxu1 %v994_v24  ;;  %v1017_v52 = vld [vmem:[%s1371_s5 + $0x30] sm:$0xff]   ;;  %v1018_v53 = vld [vmem:[%s1371_s5 + $0x28] sm:$0xff]   ;;  %v1020_v55 = vld [vmem:[%s1371_s5 + $0x18] sm:$0xff]   ;;  %vm582_vm8 = vcmask 785408   ;;  %vm1161_vm9 = vmmov 0   ;;  %s1162_s19 = smov [#allocation10]  }
  0x44   :  { %247 = vmatprep.subr.bf16.mxu0 %v971_v15  ;;  %426 = vmatprep.subr.bf16.mxu1 %v995_v26  ;;  %v1021_v56 = vld [vmem:[%s1371_s5 + $0x10] sm:$0xff]   ;;  %v1022_v57 = vld [vmem:[%s1371_s5 + $0x8] sm:$0xff]   ;;  %v1023_v58 = vld [vmem:[%s1371_s5] sm:$0xff]   ;;  %v137_v1 = vsub.s32 0, %v136_v63  ;;  %v141_v3 = vsub.s32 1, %v136_v63  ;;  %s815_s7 = sshll.u32 %s1162_s19, 4  ;;  %s816_s7 = int_to_ptr.vmem [resolvable:$true] %s815_s7 }
  0x45   :  { %v1024_v59 = vld [vmem:[%s1371_s5 + $0x68] sm:$0xff]   ;;  %v1025_v60 = vld [vmem:[%s1371_s5 + $0x60] sm:$0xff]   ;;  %v1026_v61 = vld [vmem:[%s1371_s5 + $0x58] sm:$0xff]   ;;  %p1125_p7 = scmp.lt.s32.totalorder %s816_s7, %s816_s7 }
  0x46   :  { %v1027_v62 = vld [vmem:[%s1371_s5 + $0x50] sm:$0xff]   ;;  %v133_v2 = vld [vmem:[%s1368_s2] sm:$0x3]  ;;  %v1028_v16 = vld [vmem:[%s1371_s5 + $0x48] sm:$0xff]  }
  0x47   :  { %248 = vmatpush1.bf16.msra.mxu0 %v973_v19  ;;  %427 = vmatpush1.bf16.msra.mxu1 %v997_v28  ;;  %v138_v4 = vrot.slane %v133_v2, %v137_v1  ;;  %v142_v5 = vrot.slane %v133_v2, %v141_v3  ;;  %v1029_v17 = vld [vmem:[%s1371_s5 + $0x40] sm:$0xff]   ;;  %v1030_v18 = vld [vmem:[#allocation7 + $0x8] sm:$0xff]   ;;  %v1160_v19 = vmov 0.0  }
  0x48   :  { %249 = vmatprep.subr.bf16.mxu0 %v974_v21  ;;  %428 = vmatprep.subr.bf16.mxu1 %v998_v30  ;;  %v304_v20 = vld [vmem:[%s1370_s4] sm:$0x3]  ;;  %v1031_v30 = vld [vmem:[#allocation7] sm:$0xff]  }
  0x49   :  { %v309_v21 = vrot.slane %v304_v20, %v137_v1  ;;  %v313_v22 = vrot.slane %v304_v20, %v141_v3  ;;  %v1034_v41 = vld [vmem:[#allocation8 + $0x28] sm:$0xff]  }
  0x4b   :  { %250 = vmatpush1.bf16.msra.mxu0 %v976_v23  ;;  %429 = vmatpush1.bf16.msra.mxu1 %v1000_v32 }
  0x4c   :  { %251 = vmatprep.subr.bf16.mxu0 %v977_v25  ;;  %430 = vmatprep.subr.bf16.mxu1 %v1001_v34 }
  0x4f   :  { %252 = vmatpush1.bf16.msra.mxu0 %v979_v27  ;;  %431 = vmatpush1.bf16.msra.mxu1 %v1003_v36 }
  0x50   :  { %253 = vmatprep.subr.bf16.mxu0 %v980_v29  ;;  %432 = vmatprep.subr.bf16.mxu1 %v1004_v37  ;;  %v1032_v37 = vld [vmem:[#allocation8 + $0x38] sm:$0xff]  }
  0x53   :  { %254 = vmatpush1.bf16.msra.mxu0 %v982_v31  ;;  %433 = vmatpush1.bf16.msra.mxu1 %v1006_v38  ;;  %v869_v31 = vld [vmem:[%s1372_s6] ss:$0 sm:$0xff] }
  0x54   :  { %269 = vmatprep.subr.bf16.mxu0 %v983_v33  ;;  %434 = vmatprep.subr.bf16.mxu1 %v1007_v39 }
  0x57   :  { %270 = vmatpush2.bf16.msra.mxu0 %v985_v35  ;;  %435 = vmatpush1.bf16.msra.mxu1 %v1009_v40  ;;  %v1033_v40 = vld [vmem:[#allocation8 + $0x30] sm:$0xff]  }
  0x58   :  { %586 = vmatprep.subr.bf16.mxu0 %v1156_v0  ;;  %448 = vmatprep.subr.bf16.mxu1 %v1010_v47  ;;  %v885_v47 = vld [vmem:[%s1374_s8] ss:$0 sm:$0xff]  ;;  %s1120_s8 = scalar_lea.vmem %s816_s7, 128 }
  0x59   :  { %p1121_p6 = scmp.ne.s32.totalorder %s816_s7, %s1120_s8  ;;  %p1126_p8 = scmp.lt.s32.totalorder %s1120_s8, %s1120_s8 }
  0x5b   :  { %449 = vmatpush2.bf16.msra.mxu1 %v1012_v48  ;;  %p1127_p9 = por %p1126_p8, %p1125_p7 }
  0x5c   :  { %450 = vmatprep.subr.bf16.mxu1 %v1013_v49 }
  0x5d   :  { %p1128_p10 = pnand %p1127_p9, %p1121_p6 }
  0x5f   :  { %451 = vmatpush2.bf16.msra.mxu1 %v1015_v50 }
  0x60   :  { %910 = vmatprep.subr.bf16.mxu1 %v1160_v19 }
  0xb4   :  { %v99_v42 = vpop.permute.xlu0 %98  ;;  %v108_v44 = vpop.permute.xlu1 %107 }
  0xb5   :  { %vm109_vm1 = vcmp.eq.s32.totalorder %v96_v43, %v108_v44  ;;  %vm100_vm2 = vcmp.eq.s32.totalorder %v96_v43, %v99_v42  ;;  %v1035_v42 = vld [vmem:[#allocation8 + $0x20] sm:$0xff]   ;;  %v1037_v44 = vld [vmem:[#allocation8 + $0x10] sm:$0xff]  }
  0xb9   :  { %v103_v45 = vpop.permute.xlu0 %102 }
  0xba   :  { %vm104_vm3 = vcmp.eq.s32.totalorder %v96_v43, %v103_v45  ;;  %v1036_v43 = vld [vmem:[#allocation8 + $0x18] sm:$0xff]   ;;  %v1038_v45 = vld [vmem:[#allocation8 + $0x8] sm:$0xff]  }
  0xbb   :  { %vm105_vm4 = vmor %vm100_vm2, %vm104_vm3 }
  0xbc   :  { %vm110_vm5 = vmor %vm105_vm4, %vm109_vm1 }
  0xbd   :  { %vm846_vm6 = vmpackc.low %vm110_vm5, %vm110_vm5 }
  0xbe   :  { %847 = vmatmul.mubr.msk.bf16.vlgmr.msra.gmra.mxu0 %vm846_vm6, %v1159_v46  ;;  %v1039_v46 = vld [vmem:[#allocation8] sm:$0xff]  }
  0xbf   :  { %587 = vmatpush1.bf16.msra.mxu0 %v1016_v51 }
  0xc0   :  { %588 = vmatprep.subr.bf16.mxu0 %v1156_v0 }
  0xc3   :  { %589 = vmatpush1.bf16.msra.mxu0 %v1017_v52 }
  0xc4   :  { %590 = vmatprep.subr.bf16.mxu0 %v1156_v0 }
  0xc7   :  { %591 = vmatpush1.bf16.msra.mxu0 %v1018_v53 }
  0xc8   :  { %592 = vmatprep.subr.bf16.mxu0 %v1156_v0 }
  0xcb   :  { %593 = vmatpush1.bf16.msra.mxu0 %v1019_v54 }
  0xcc   :  { %594 = vmatprep.subr.bf16.mxu0 %v1156_v0 }
  0xcf   :  { %595 = vmatpush1.bf16.msra.mxu0 %v1020_v55 }
  0xd0   :  { %596 = vmatprep.subr.bf16.mxu0 %v1156_v0 }
  0xd3   :  { %597 = vmatpush1.bf16.msra.mxu0 %v1021_v56  ;;  %v889_v56 = vld [vmem:[%s1376_s10] ss:$0 sm:$0xff] }
  0xd4   :  { %598 = vmatprep.subr.bf16.mxu0 %v1156_v0 }
  0xd7   :  { %599 = vmatpush1.bf16.msra.mxu0 %v1022_v57 }
  0xd8   :  { %600 = vmatprep.subr.bf16.mxu0 %v1156_v0 }
  0xdb   :  { %601 = vmatpush1.bf16.msra.mxu0 %v1023_v58 }
  0xdc   :  { %606 = vmatprep.subr.bf16.mxu0 %v1156_v0 }
  0xdf   :  { %607 = vmatpush2.bf16.msra.mxu0 %v1024_v59 }
  0xe0   :  { %608 = vmatprep.subr.bf16.mxu0 %v1156_v0 }
  0xe3   :  { %609 = vmatpush2.bf16.msra.mxu0 %v1025_v60 }
  0xe4   :  { %610 = vmatprep.subr.bf16.mxu0 %v1156_v0 }
  0xe7   :  { %611 = vmatpush2.bf16.msra.mxu0 %v1026_v61 }
  0xe8   :  { %612 = vmatprep.subr.bf16.mxu0 %v1156_v0 }
  0xeb   :  { %613 = vmatpush2.bf16.msra.mxu0 %v1027_v62 }
  0xec   :  { %614 = vmatprep.subr.bf16.mxu0 %v1156_v0 }
  0xef   :  { %615 = vmatpush2.bf16.msra.mxu0 %v1028_v16 }
  0xf0   :  { %616 = vmatprep.subr.bf16.mxu0 %v1156_v0 }
  0xf3   :  { %617 = vmatpush2.bf16.msra.mxu0 %v1029_v17 }
 0x17e   :  { %v273_v6 = vpop.f32.mrf.mxu0 }
 0x17f   :  { %v274_v7 = vadd.f32 %v273_v6, %v138_v4 }
 0x180   :  { %v275_v8 = vpop.f32.mrf.mxu0 }
 0x181   :  { %v276_v9 = vadd.f32 %v275_v8, %v142_v5  ;;  %v280_v10 = vmax.f32 %v274_v7, 0.0 }
 0x182   :  { %v277_v11 = vpop.f32.mrf.mxu0 }
 0x183   :  { %v281_v12 = vmax.f32 %v276_v9, 0.0  ;;  %v282_v15 = vpack.c.bf16 %v280_v10, %v280_v10 }
 0x184   :  { %v278_v13 = vpop.f32.mrf.mxu0 }
 0x185   :  { %v283_v14 = vpack.c.bf16 %v281_v12, %v281_v12 }
 0x187   :  { %868 = vmatprep.mubr.msk.bf16.mxu1 %vm416_vm7, %v283_v14 }
 0x188   :  { %453 = vmatmul.mubr.bf16.vlgmr.msra.gmra.mxu1 %v282_v15 }
 0x189   :  { %911 = vmatpush3.bf16.msra.mxu1 %v1030_v18  ;;  %914 = vmatprep.mubr.msk.bf16.mxu1 %vm1161_vm9, %v1160_v19 }
 0x18a   :  { %912 = vmatprep.subr.bf16.mxu1 %v1160_v19 }
 0x18d   :  { %913 = vmatpush3.bf16.msra.mxu1 %v1031_v30 }
 0x18e   :  { %918 = vmatprep.subr.bf16.mxu1 %v1160_v19 }
 0x248   :  { %v454_v23 = vpop.f32.mrf.mxu1 }
 0x249   :  { %v455_v24 = vadd.f32 %v454_v23, %v309_v21 }
 0x24a   :  { %v456_v25 = vpop.f32.mrf.mxu1 }
 0x24b   :  { %v457_v0 = vadd.f32 %v456_v25, %v313_v22  ;;  %v461_v28 = vpack.c.bf16 %v455_v24, %v455_v24 }
 0x24c   :  { %v458_v26 = vpop.f32.mrf.mxu1 }
 0x24d   :  { %v462_v27 = vpack.c.bf16 %v457_v0, %v457_v0 }
 0x24e   :  { %v459_v29 = vpop.f32.mrf.mxu1 }
 0x24f   :  { %884 = vmatprep.mubr.msk.bf16.mxu0 %vm582_vm8, %v462_v27 }
 0x250   :  { %619 = vmatmul.mubr.bf16.vlgmr.msra.gmra.mxu0 %v461_v28 }
 0x310   :  { %v620_v32 = vpop.f32.mrf.mxu0 }
 0x311   :  { %v621_v33 = vadd.f32 %v869_v31, %v620_v32 }
 0x312   :  { %v622_v34 = vpop.f32.mrf.mxu0 }
 0x313   :  { %v626_v35 = vmax.f32 %v621_v33, 0.0 }
 0x314   :  { %v623_v36 = vpop.f32.mrf.mxu0 }
 0x315   :  { %v627_v38 = vpack.c.bf16 %v626_v35, %v626_v35 }
 0x316   :  { %v624_v39 = vpop.f32.mrf.mxu0 }
 0x317   :  { %915 = vmatmul.mubr.msk.bf16.vlgmr.msra.gmra.mxu1 %vm416_vm7, %v627_v38 }
 0x318   :  { %919 = vmatpush3.bf16.msra.mxu1 %v1032_v37  ;;  %934 = vmatprep.mubr.msk.bf16.mxu1 %vm1161_vm9, %v1160_v19 }
 0x319   :  { %920 = vmatprep.subr.bf16.mxu1 %v1160_v19 }
 0x31c   :  { %921 = vmatpush3.bf16.msra.mxu1 %v1033_v40 }
 0x31d   :  { %922 = vmatprep.subr.bf16.mxu1 %v1160_v19 }
 0x320   :  { %923 = vmatpush3.bf16.msra.mxu1 %v1034_v41 }
 0x321   :  { %924 = vmatprep.subr.bf16.mxu1 %v1160_v19 }
 0x324   :  { %925 = vmatpush3.bf16.msra.mxu1 %v1035_v42 }
 0x325   :  { %926 = vmatprep.subr.bf16.mxu1 %v1160_v19 }
 0x328   :  { %927 = vmatpush3.bf16.msra.mxu1 %v1036_v43 }
 0x329   :  { %928 = vmatprep.subr.bf16.mxu1 %v1160_v19 }
 0x32c   :  { %929 = vmatpush3.bf16.msra.mxu1 %v1037_v44 }
 0x32d   :  { %930 = vmatprep.subr.bf16.mxu1 %v1160_v19 }
 0x330   :  { %931 = vmatpush3.bf16.msra.mxu1 %v1038_v45 }
 0x331   :  { %932 = vmatprep.subr.bf16.mxu1 %v1160_v19 }
 0x334   :  { %933 = vmatpush3.bf16.msra.mxu1 %v1039_v46 }
 0x3d7   :  { %v688_v48 = vpop.f32.mrf.mxu1 }
 0x3d8   :  { %v689_v49 = vadd.f32 %v885_v47, %v688_v48 }
 0x3d9   :  { %v916_v50 = vpop.f32.mrf.mxu1 }
 0x3da   :  { %v694_v51 = vadd.f32 %v689_v49, %v455_v24 }
 0x3db   :  { %v691_v52 = vpop.f32.mrf.mxu1 }
 0x3dc   :  { %v695_v53 = vmax.f32 %v694_v51, 0.0 }
 0x3dd   :  { %v917_v54 = vpop.f32.mrf.mxu1 }
 0x3de   :  { %v696_v55 = vpack.c.bf16 %v695_v53, %v695_v53 }
 0x3e0   :  { %935 = vmatmul.mubr.bf16.vlgmr.msra.gmra.mxu1 %v696_v55 }
 0x4a0   :  { %v802_v57 = vpop.f32.mrf.mxu1 }
 0x4a1   :  { %v803_v58 = vadd.f32 %v889_v56, %v802_v57 }
 0x4a2   :  { %v936_v59 = vpop.f32.mrf.mxu1 }
 0x4a3   :  { %808 = vst [vmem:[#allocation10] sm:$0xff] %v803_v58 }
 0x4a4   :  { %v805_v60 = vpop.f32.mrf.mxu1 }
 0x4a5   :  { %1131 = shalt.err (!%p1128_p10)
}
 0x4a6   :  { %818 = dma.vmem_to_hbm [thread:$0]  %s816_s7, 128, %s1377_s11, [#allocation4]   ;;  %v937_v61 = vpop.f32.mrf.mxu1 }
 0x4a7   :  { %1146 = dma.done.wait [#allocation4], 128  }
 0x4a8   :  { %1147 = vsyncadd [#allocation4], 4294967168 }
 0x4a9   :  { %822 = vsyncpa [#allocation3], 1 }
 0x4aa   :  { %823 = vsyncpa [#allocation6], 1 }
 0x4ab   :  { %824 = vsyncpa [#allocation9], 1 }
 0x4ac   :  { %825 = vsyncpa [#allocation4], 1 }

</bundles_post_ra>
